<compile_context>
chip_gen: v5e
topology: v5e:2x2
jax: 0.10.0
libtpu: 0.0.40
codegen_flags: <defaults>
</compile_context>

<pallas_src>
import functools

import numpy as np
import jax
import jax.numpy as jnp
from jax import lax
from jax.experimental import pallas as pl
from jax.experimental.pallas import tpu as pltpu

H, W = 64, 128  # phase-plane table size


def build_neuron_meshgrid():
    umin, umax = 0.0, 1.0
    vmin, vmax = 0.0, 1.0
    uu, vv = np.meshgrid(
        np.linspace(umin, umax, H, dtype=np.float32),
        np.linspace(vmin, vmax, W, dtype=np.float32),
        indexing="ij",
    )
    iCv = (1.0e-12 * np.cos(3.0 * vv) - 0.5e-12 * uu).astype(np.float32)
    iCu = (0.8e-12 * np.sin(2.0 * uu) - 0.3e-12 * vv).astype(np.float32)
    axon = (np.sin(7.0 * vv + 3.0 * uu) > 0.95).astype(np.float32)
    return dict(
        iCv=jnp.asarray(iCv),
        iCu=jnp.asarray(iCu),
        axon=jnp.asarray(axon),
        vmax=float(vmax), vmin=float(vmin),
        umax=float(umax), umin=float(umin),
        i_per_y=float((H - 1) / (umax - umin)),
        j_per_x=float((W - 1) / (vmax - vmin)),
    )


def _sim_kernel(tabv_ref, tabu_ref, axon_ref,
                spikes_ref, v_out_ref, u_out_ref, vt_ref, st_ref,
                *, num_steps, unroll, record,
                vmin_s, vmax_s, umin_s, umax_s, u_quirk_s,
                u_rail_is_minmax, need_clip_i, need_clip_j, Ht, Wt):
    """Scalar Euler loop in 'index units' (state pre-scaled by i_per_y/j_per_x).

    tabv_ref = (iCv + input) * dt/Cv * j_per_x      (input drive folded in)
    tabu_ref =  iCu          * dt/Cu * i_per_y
    """

    def step(t, carry):
        vv, uu, _ = carry

        # fetch_current: int() truncates toward zero == f32->s32 convert
        # (post-rail scaled state is non-negative for this mesh).
        i_idx = uu.astype(jnp.int32)
        j_idx = vv.astype(jnp.int32)
        if need_clip_i:                       # static: only for meshes where the
            i_idx = jnp.clip(i_idx, 0, Ht - 1)  # rails don't bound the index range
        if need_clip_j:
            j_idx = jnp.clip(j_idx, 0, Wt - 1)

        dv = tabv_ref[i_idx, j_idx]           # direct SMEM scalar lookups
        du = tabu_ref[i_idx, j_idx]
        ax = axon_ref[i_idx, j_idx]

        # Euler update (all scaling pre-folded into the tables).
        vv_new = vv + dv
        uu_new = uu + du

        # rail_out in scaled units.
        vv_r = jnp.minimum(jnp.maximum(vv_new, vmin_s), vmax_s)
        if u_rail_is_minmax:
            # umax == vmax  =>  the `u > umax -> vmax` quirk is just a clamp.
            uu_r = jnp.minimum(jnp.maximum(uu_new, umin_s), umax_s)
        else:
            # preserve the original module's quirk exactly
            uu_r = jnp.where(uu_new > umax_s, u_quirk_s, uu_new)
            uu_r = jnp.where(uu_new < umin_s, umin_s, uu_r)

        if record:
            vt_ref[t] = vv_r                  # post-rail v (scaled), un-scaled later
            st_ref[t] = ax
        return (vv_r, uu_r, ax)

    if not record:
        # traces are (1,) dummies in this mode; write once so they're defined.
        vt_ref[0] = jnp.float32(0.0)
        st_ref[0] = jnp.float32(0.0)

    carry = (jnp.float32(0.0), jnp.float32(0.0), jnp.float32(0.0))

    n_blocks = num_steps // unroll
    rem = num_steps - n_blocks * unroll

    def block(b, c):
        t0 = b * unroll
        for kk in range(unroll):              # manual partial unroll
            c = step(t0 + kk, c)
        return c

    carry = lax.fori_loop(0, n_blocks, block, carry)
    for kk in range(rem):                     # static remainder
        carry = step(n_blocks * unroll + kk, carry)

    vv_f, uu_f, s_f = carry
    spikes_ref[0, 0] = s_f
    v_out_ref[0, 0] = vv_f
    u_out_ref[0, 0] = uu_f


def make_sim_fn(mesh, dt, Cv, Cu, num_steps, record=True, unroll=8):
    icv_np = np.asarray(mesh["iCv"])
    Ht, Wt = icv_np.shape
    i_per_y = float(mesh["i_per_y"])
    j_per_x = float(mesh["j_per_x"])
    vmax, vmin = float(mesh["vmax"]), float(mesh["vmin"])
    umax, umin = float(mesh["umax"]), float(mesh["umin"])
    dt_over_Cv = dt / Cv
    dt_over_Cu = dt / Cu

    # Rail constants in index units.
    vmin_s, vmax_s = vmin * j_per_x, vmax * j_per_x
    umin_s, umax_s = umin * i_per_y, umax * i_per_y
    u_quirk_s = vmax * i_per_y                # the `u > umax -> u = vmax` value
    u_rail_is_minmax = (umax == vmax)

    # Static check: can the (railed) scaled state ever index out of the table?
    u_reach_hi = max(umax_s, u_quirk_s)       # quirk may push u up to vmax
    need_clip_i = not (umin_s >= 0.0 and u_reach_hi <= Ht - 1)
    need_clip_j = not (vmin_s >= 0.0 and vmax_s <= Wt - 1)

    kernel = functools.partial(
        _sim_kernel,
        num_steps=num_steps, unroll=unroll, record=record,
        vmin_s=vmin_s, vmax_s=vmax_s, umin_s=umin_s, umax_s=umax_s,
        u_quirk_s=u_quirk_s, u_rail_is_minmax=u_rail_is_minmax,
        need_clip_i=need_clip_i, need_clip_j=need_clip_j, Ht=Ht, Wt=Wt,
    )

    def smem_spec():
        return pl.BlockSpec(memory_space=pltpu.MemorySpace.SMEM)

    trace_len = num_steps if record else 1
    # TODO(synk): for num_steps >~ 1e4 move v_t/s_t to VMEM-chunked outputs to
    # avoid SMEM exhaustion; fine at 1000 steps (4 KiB each).
    call = pl.pallas_call(
        kernel,
        out_shape=(
            jax.ShapeDtypeStruct((1, 1), jnp.float32),         # spikes (axon)
            jax.ShapeDtypeStruct((1, 1), jnp.float32),         # v (final, scaled)
            jax.ShapeDtypeStruct((1, 1), jnp.float32),         # u (final, scaled)
            jax.ShapeDtypeStruct((trace_len,), jnp.float32),   # v_t trace (scaled)
            jax.ShapeDtypeStruct((trace_len,), jnp.float32),   # s_t trace
        ),
        in_specs=[smem_spec(), smem_spec(), smem_spec()],
        out_specs=tuple(smem_spec() for _ in range(5)),
    )

    scale_v = jnp.float32(dt_over_Cv * j_per_x)
    scale_u = jnp.float32(dt_over_Cu * i_per_y)
    j_f32 = jnp.float32(j_per_x)
    i_f32 = jnp.float32(i_per_y)

    @jax.jit
    def sim(inp, icv, icu, axon):
        # Fold dt/C, the index scaling AND the constant input drive into the
        # tables ONCE (cheap (64,128) vector ops, off the serial scalar chain).
        tab_v = (icv + inp[0, 0]) * scale_v
        tab_u = icu * scale_u
        spikes, vv, uu, vt_s, st = call(tab_v, tab_u, axon)
        # Un-scale back to physical units (one vector op).
        return spikes, vv / j_f32, uu / i_f32, vt_s / j_f32, st

    return sim


class SpikingNeuron:
    """JAX/Pallas port of the PyTorch SpikingNeuron module (forward only).

    `forward(input, num_steps)` runs `num_steps` Euler steps fused into ONE
    Pallas kernel call (equivalent to calling the original forward with
    num_steps = 0, 1, ..., num_steps-1 and a constant input).
    """

    def __init__(self, neuron_meshgrid, dt=1e-06, Tsim=0.001,
                 Cv=5e-14, Cu=3e-14, record=True):
        self.neuron_meshgrid = neuron_meshgrid
        self.dt = dt
        self.Cv = Cv
        self.Cu = Cu
        self.Tsim = Tsim
        self.record = record
        self._sim_cache = {}

    def _sim_fn(self, num_steps):
        key = (num_steps, self.record)
        fn = self._sim_cache.get(key)
        if fn is None:
            fn = make_sim_fn(self.neuron_meshgrid, self.dt, self.Cv, self.Cu,
                             num_steps, record=self.record)
            self._sim_cache[key] = fn
        return fn

    def forward(self, input, num_steps):
        assert num_steps >= 1, "num_steps must be >= 1"
        mesh = self.neuron_meshgrid
        inp = jnp.asarray(input, jnp.float32).reshape(1, 1)
        self.batch_size = inp.shape[0]
        # Iv / Iu attributes stay zeros — the original module initializes them
        # but never assigns the per-step values either.
        self.Iv = jnp.zeros((1, 1), jnp.float32)
        self.Iu = jnp.zeros((1, 1), jnp.float32)

        spikes, v, u, v_t, s_t = self._sim_fn(num_steps)(
            inp, mesh["iCv"], mesh["iCu"], mesh["axon"])
        self.spikes, self.v, self.u = spikes, v, u
        if self.record:
            self.v_t = v_t.reshape(num_steps, 1, 1)
            self.s_t = s_t.reshape(num_steps, 1, 1)
        return (self.spikes, self.v)


def reference_forward(mesh, inp, num_steps, dt, Cv, Cu):
    """Pure-Python port of the original PyTorch step loop (spec reference)."""
    icv = np.asarray(mesh["iCv"])
    icu = np.asarray(mesh["iCu"])
    axn = np.asarray(mesh["axon"])
    i_per_y, j_per_x = mesh["i_per_y"], mesh["j_per_x"]
    vmax, vmin = mesh["vmax"], mesh["vmin"]
    umax, umin = mesh["umax"], mesh["umin"]
    x = float(np.asarray(inp).reshape(-1)[0])

    v = 0.0
    u = 0.0
    spikes = 0.0
    v_t = []
    for _ in range(num_steps):
        i = int(u * i_per_y)
        j = int(v * j_per_x)
        Iv = float(icv[i, j]); Iu = float(icu[i, j]); ax = float(axn[i, j])
        v = v + (Iv + x) / Cv * dt
        u = u + Iu / Cu * dt
        spikes = ax
        if v > vmax: v = vmax
        if v < vmin: v = vmin
        if u > umax: u = vmax   # original module's quirk, preserved
        if u < umin: u = umin
        v_t.append(v)
    return spikes, v, np.array(v_t)


if __name__ == "__main__":
    mesh = build_neuron_meshgrid()
    neuron = SpikingNeuron(mesh)

    # deterministic small input (same shape/scale as torch.tensor([[3e-12]]))
    key = jax.random.PRNGKey(0)
    inp = jax.random.uniform(key, (1, 1), dtype=jnp.float32) * 6e-12

    num_steps = int(round(neuron.Tsim / neuron.dt))  # 1000 Euler steps, ONE kernel call
    spikes, v = neuron.forward(inp, num_steps)
    jax.block_until_ready((spikes, v, neuron.v_t, neuron.s_t))

    assert spikes.shape == (1, 1) and v.shape == (1, 1)
    assert neuron.v_t.shape == (num_steps, 1, 1)
    assert bool(jnp.all(jnp.isfinite(v)))

    # Verify against the pure-Python port of the original PyTorch loop.
    ref_s, ref_v, ref_vt = reference_forward(mesh, np.asarray(inp), num_steps,
                                             neuron.dt, neuron.Cv, neuron.Cu)
    np.testing.assert_allclose(float(v[0, 0]), ref_v, rtol=5e-3, atol=5e-5)
    np.testing.assert_allclose(np.asarray(neuron.v_t).reshape(-1), ref_vt,
                               rtol=5e-3, atol=5e-5)

    # record=False fast path (no per-step trace stores) — short smoke test.
    neuron_nr = SpikingNeuron(mesh, record=False)
    s2, v2 = neuron_nr.forward(inp, 16)
    jax.block_until_ready((s2, v2))
    _, ref_v2, _ = reference_forward(mesh, np.asarray(inp), 16,
                                     neuron.dt, neuron.Cv, neuron.Cu)
    np.testing.assert_allclose(float(v2[0, 0]), ref_v2, rtol=5e-3, atol=5e-5)

    print("KERNEL_OK")
</pallas_src>

<mosaic_0001>
module attributes {stable_mosaic.version = 11 : i64} {
  func.func @_sim_kernel(%arg0: memref<64x128xf32, #tpu.memory_space<smem>>, %arg1: memref<64x128xf32, #tpu.memory_space<smem>>, %arg2: memref<64x128xf32, #tpu.memory_space<smem>>, %arg3: memref<1x1xf32, #tpu.memory_space<smem>>, %arg4: memref<1x1xf32, #tpu.memory_space<smem>>, %arg5: memref<1x1xf32, #tpu.memory_space<smem>>, %arg6: memref<1000xf32, #tpu.memory_space<smem>>, %arg7: memref<1000xf32, #tpu.memory_space<smem>>) attributes {dimension_semantics = [], scalar_prefetch = 0 : i64, scratch_operands = 0 : i64, tpu.core_type = #tpu.core_type<tc>} {
    %cst = arith.constant 0.000000e+00 : f32
    %cst_0 = arith.constant 0.000000e+00 : f32
    %cst_1 = arith.constant 0.000000e+00 : f32
    %c0_i32 = arith.constant 0 : i32
    %c125_i32 = arith.constant 125 : i32
    %0 = arith.addi %c0_i32, %c125_i32 : i32
    %c1_i32 = arith.constant 1 : i32
    %1:3 = scf.for %arg8 = %c0_i32 to %0 step %c1_i32 iter_args(%arg9 = %cst, %arg10 = %cst_0, %arg11 = %cst_1) -> (f32, f32, f32)  : i32 {
      %c8_i32 = arith.constant 8 : i32
      %5 = arith.muli %arg8, %c8_i32 : i32
      %c0_i32_8 = arith.constant 0 : i32
      %6 = arith.addi %5, %c0_i32_8 : i32
      %7 = arith.fptosi %arg10 : f32 to i32
      %8 = arith.fptosi %arg9 : f32 to i32
      %9 = arith.index_cast %7 : i32 to index
      %10 = arith.index_cast %8 : i32 to index
      %11 = memref.load %arg0[%9, %10] : memref<64x128xf32, #tpu.memory_space<smem>>
      %12 = arith.index_cast %7 : i32 to index
      %13 = arith.index_cast %8 : i32 to index
      %14 = memref.load %arg1[%12, %13] : memref<64x128xf32, #tpu.memory_space<smem>>
      %15 = arith.index_cast %7 : i32 to index
      %16 = arith.index_cast %8 : i32 to index
      %17 = memref.load %arg2[%15, %16] : memref<64x128xf32, #tpu.memory_space<smem>>
      %18 = arith.addf %arg9, %11 : f32
      %19 = arith.addf %arg10, %14 : f32
      %cst_9 = arith.constant 0.000000e+00 : f32
      %20 = arith.maximumf %18, %cst_9 : f32
      %cst_10 = arith.constant 1.270000e+02 : f32
      %21 = arith.minimumf %20, %cst_10 : f32
      %cst_11 = arith.constant 0.000000e+00 : f32
      %22 = arith.maximumf %19, %cst_11 : f32
      %cst_12 = arith.constant 6.300000e+01 : f32
      %23 = arith.minimumf %22, %cst_12 : f32
      %24 = arith.index_cast %6 : i32 to index
      %25 = memref.load %arg6[%24] : memref<1000xf32, #tpu.memory_space<smem>>
      memref.store %21, %arg6[%24] : memref<1000xf32, #tpu.memory_space<smem>>
      %26 = arith.index_cast %6 : i32 to index
      %27 = memref.load %arg7[%26] : memref<1000xf32, #tpu.memory_space<smem>>
      memref.store %17, %arg7[%26] : memref<1000xf32, #tpu.memory_space<smem>>
      %c1_i32_13 = arith.constant 1 : i32
      %28 = arith.addi %5, %c1_i32_13 : i32
      %29 = arith.fptosi %23 : f32 to i32
      %30 = arith.fptosi %21 : f32 to i32
      %31 = arith.index_cast %29 : i32 to index
      %32 = arith.index_cast %30 : i32 to index
      %33 = memref.load %arg0[%31, %32] : memref<64x128xf32, #tpu.memory_space<smem>>
      %34 = arith.index_cast %29 : i32 to index
      %35 = arith.index_cast %30 : i32 to index
      %36 = memref.load %arg1[%34, %35] : memref<64x128xf32, #tpu.memory_space<smem>>
      %37 = arith.index_cast %29 : i32 to index
      %38 = arith.index_cast %30 : i32 to index
      %39 = memref.load %arg2[%37, %38] : memref<64x128xf32, #tpu.memory_space<smem>>
      %40 = arith.addf %21, %33 : f32
      %41 = arith.addf %23, %36 : f32
      %cst_14 = arith.constant 0.000000e+00 : f32
      %42 = arith.maximumf %40, %cst_14 : f32
      %cst_15 = arith.constant 1.270000e+02 : f32
      %43 = arith.minimumf %42, %cst_15 : f32
      %cst_16 = arith.constant 0.000000e+00 : f32
      %44 = arith.maximumf %41, %cst_16 : f32
      %cst_17 = arith.constant 6.300000e+01 : f32
      %45 = arith.minimumf %44, %cst_17 : f32
      %46 = arith.index_cast %28 : i32 to index
      %47 = memref.load %arg6[%46] : memref<1000xf32, #tpu.memory_space<smem>>
      memref.store %43, %arg6[%46] : memref<1000xf32, #tpu.memory_space<smem>>
      %48 = arith.index_cast %28 : i32 to index
      %49 = memref.load %arg7[%48] : memref<1000xf32, #tpu.memory_space<smem>>
      memref.store %39, %arg7[%48] : memref<1000xf32, #tpu.memory_space<smem>>
      %c2_i32 = arith.constant 2 : i32
      %50 = arith.addi %5, %c2_i32 : i32
      %51 = arith.fptosi %45 : f32 to i32
      %52 = arith.fptosi %43 : f32 to i32
      %53 = arith.index_cast %51 : i32 to index
      %54 = arith.index_cast %52 : i32 to index
      %55 = memref.load %arg0[%53, %54] : memref<64x128xf32, #tpu.memory_space<smem>>
      %56 = arith.index_cast %51 : i32 to index
      %57 = arith.index_cast %52 : i32 to index
      %58 = memref.load %arg1[%56, %57] : memref<64x128xf32, #tpu.memory_space<smem>>
      %59 = arith.index_cast %51 : i32 to index
      %60 = arith.index_cast %52 : i32 to index
      %61 = memref.load %arg2[%59, %60] : memref<64x128xf32, #tpu.memory_space<smem>>
      %62 = arith.addf %43, %55 : f32
      %63 = arith.addf %45, %58 : f32
      %cst_18 = arith.constant 0.000000e+00 : f32
      %64 = arith.maximumf %62, %cst_18 : f32
      %cst_19 = arith.constant 1.270000e+02 : f32
      %65 = arith.minimumf %64, %cst_19 : f32
      %cst_20 = arith.constant 0.000000e+00 : f32
      %66 = arith.maximumf %63, %cst_20 : f32
      %cst_21 = arith.constant 6.300000e+01 : f32
      %67 = arith.minimumf %66, %cst_21 : f32
      %68 = arith.index_cast %50 : i32 to index
      %69 = memref.load %arg6[%68] : memref<1000xf32, #tpu.memory_space<smem>>
      memref.store %65, %arg6[%68] : memref<1000xf32, #tpu.memory_space<smem>>
      %70 = arith.index_cast %50 : i32 to index
      %71 = memref.load %arg7[%70] : memref<1000xf32, #tpu.memory_space<smem>>
      memref.store %61, %arg7[%70] : memref<1000xf32, #tpu.memory_space<smem>>
      %c3_i32 = arith.constant 3 : i32
      %72 = arith.addi %5, %c3_i32 : i32
      %73 = arith.fptosi %67 : f32 to i32
      %74 = arith.fptosi %65 : f32 to i32
      %75 = arith.index_cast %73 : i32 to index
      %76 = arith.index_cast %74 : i32 to index
      %77 = memref.load %arg0[%75, %76] : memref<64x128xf32, #tpu.memory_space<smem>>
      %78 = arith.index_cast %73 : i32 to index
      %79 = arith.index_cast %74 : i32 to index
      %80 = memref.load %arg1[%78, %79] : memref<64x128xf32, #tpu.memory_space<smem>>
      %81 = arith.index_cast %73 : i32 to index
      %82 = arith.index_cast %74 : i32 to index
      %83 = memref.load %arg2[%81, %82] : memref<64x128xf32, #tpu.memory_space<smem>>
      %84 = arith.addf %65, %77 : f32
      %85 = arith.addf %67, %80 : f32
      %cst_22 = arith.constant 0.000000e+00 : f32
      %86 = arith.maximumf %84, %cst_22 : f32
      %cst_23 = arith.constant 1.270000e+02 : f32
      %87 = arith.minimumf %86, %cst_23 : f32
      %cst_24 = arith.constant 0.000000e+00 : f32
      %88 = arith.maximumf %85, %cst_24 : f32
      %cst_25 = arith.constant 6.300000e+01 : f32
      %89 = arith.minimumf %88, %cst_25 : f32
      %90 = arith.index_cast %72 : i32 to index
      %91 = memref.load %arg6[%90] : memref<1000xf32, #tpu.memory_space<smem>>
      memref.store %87, %arg6[%90] : memref<1000xf32, #tpu.memory_space<smem>>
      %92 = arith.index_cast %72 : i32 to index
      %93 = memref.load %arg7[%92] : memref<1000xf32, #tpu.memory_space<smem>>
      memref.store %83, %arg7[%92] : memref<1000xf32, #tpu.memory_space<smem>>
      %c4_i32 = arith.constant 4 : i32
      %94 = arith.addi %5, %c4_i32 : i32
      %95 = arith.fptosi %89 : f32 to i32
      %96 = arith.fptosi %87 : f32 to i32
      %97 = arith.index_cast %95 : i32 to index
      %98 = arith.index_cast %96 : i32 to index
      %99 = memref.load %arg0[%97, %98] : memref<64x128xf32, #tpu.memory_space<smem>>
      %100 = arith.index_cast %95 : i32 to index
      %101 = arith.index_cast %96 : i32 to index
      %102 = memref.load %arg1[%100, %101] : memref<64x128xf32, #tpu.memory_space<smem>>
      %103 = arith.index_cast %95 : i32 to index
      %104 = arith.index_cast %96 : i32 to index
      %105 = memref.load %arg2[%103, %104] : memref<64x128xf32, #tpu.memory_space<smem>>
      %106 = arith.addf %87, %99 : f32
      %107 = arith.addf %89, %102 : f32
      %cst_26 = arith.constant 0.000000e+00 : f32
      %108 = arith.maximumf %106, %cst_26 : f32
      %cst_27 = arith.constant 1.270000e+02 : f32
      %109 = arith.minimumf %108, %cst_27 : f32
      %cst_28 = arith.constant 0.000000e+00 : f32
      %110 = arith.maximumf %107, %cst_28 : f32
      %cst_29 = arith.constant 6.300000e+01 : f32
      %111 = arith.minimumf %110, %cst_29 : f32
      %112 = arith.index_cast %94 : i32 to index
      %113 = memref.load %arg6[%112] : memref<1000xf32, #tpu.memory_space<smem>>
      memref.store %109, %arg6[%112] : memref<1000xf32, #tpu.memory_space<smem>>
      %114 = arith.index_cast %94 : i32 to index
      %115 = memref.load %arg7[%114] : memref<1000xf32, #tpu.memory_space<smem>>
      memref.store %105, %arg7[%114] : memref<1000xf32, #tpu.memory_space<smem>>
      %c5_i32 = arith.constant 5 : i32
      %116 = arith.addi %5, %c5_i32 : i32
      %117 = arith.fptosi %111 : f32 to i32
      %118 = arith.fptosi %109 : f32 to i32
      %119 = arith.index_cast %117 : i32 to index
      %120 = arith.index_cast %118 : i32 to index
      %121 = memref.load %arg0[%119, %120] : memref<64x128xf32, #tpu.memory_space<smem>>
      %122 = arith.index_cast %117 : i32 to index
      %123 = arith.index_cast %118 : i32 to index
      %124 = memref.load %arg1[%122, %123] : memref<64x128xf32, #tpu.memory_space<smem>>
      %125 = arith.index_cast %117 : i32 to index
      %126 = arith.index_cast %118 : i32 to index
      %127 = memref.load %arg2[%125, %126] : memref<64x128xf32, #tpu.memory_space<smem>>
      %128 = arith.addf %109, %121 : f32
      %129 = arith.addf %111, %124 : f32
      %cst_30 = arith.constant 0.000000e+00 : f32
      %130 = arith.maximumf %128, %cst_30 : f32
      %cst_31 = arith.constant 1.270000e+02 : f32
      %131 = arith.minimumf %130, %cst_31 : f32
      %cst_32 = arith.constant 0.000000e+00 : f32
      %132 = arith.maximumf %129, %cst_32 : f32
      %cst_33 = arith.constant 6.300000e+01 : f32
      %133 = arith.minimumf %132, %cst_33 : f32
      %134 = arith.index_cast %116 : i32 to index
      %135 = memref.load %arg6[%134] : memref<1000xf32, #tpu.memory_space<smem>>
      memref.store %131, %arg6[%134] : memref<1000xf32, #tpu.memory_space<smem>>
      %136 = arith.index_cast %116 : i32 to index
      %137 = memref.load %arg7[%136] : memref<1000xf32, #tpu.memory_space<smem>>
      memref.store %127, %arg7[%136] : memref<1000xf32, #tpu.memory_space<smem>>
      %c6_i32 = arith.constant 6 : i32
      %138 = arith.addi %5, %c6_i32 : i32
      %139 = arith.fptosi %133 : f32 to i32
      %140 = arith.fptosi %131 : f32 to i32
      %141 = arith.index_cast %139 : i32 to index
      %142 = arith.index_cast %140 : i32 to index
      %143 = memref.load %arg0[%141, %142] : memref<64x128xf32, #tpu.memory_space<smem>>
      %144 = arith.index_cast %139 : i32 to index
      %145 = arith.index_cast %140 : i32 to index
      %146 = memref.load %arg1[%144, %145] : memref<64x128xf32, #tpu.memory_space<smem>>
      %147 = arith.index_cast %139 : i32 to index
      %148 = arith.index_cast %140 : i32 to index
      %149 = memref.load %arg2[%147, %148] : memref<64x128xf32, #tpu.memory_space<smem>>
      %150 = arith.addf %131, %143 : f32
      %151 = arith.addf %133, %146 : f32
      %cst_34 = arith.constant 0.000000e+00 : f32
      %152 = arith.maximumf %150, %cst_34 : f32
      %cst_35 = arith.constant 1.270000e+02 : f32
      %153 = arith.minimumf %152, %cst_35 : f32
      %cst_36 = arith.constant 0.000000e+00 : f32
      %154 = arith.maximumf %151, %cst_36 : f32
      %cst_37 = arith.constant 6.300000e+01 : f32
      %155 = arith.minimumf %154, %cst_37 : f32
      %156 = arith.index_cast %138 : i32 to index
      %157 = memref.load %arg6[%156] : memref<1000xf32, #tpu.memory_space<smem>>
      memref.store %153, %arg6[%156] : memref<1000xf32, #tpu.memory_space<smem>>
      %158 = arith.index_cast %138 : i32 to index
      %159 = memref.load %arg7[%158] : memref<1000xf32, #tpu.memory_space<smem>>
      memref.store %149, %arg7[%158] : memref<1000xf32, #tpu.memory_space<smem>>
      %c7_i32 = arith.constant 7 : i32
      %160 = arith.addi %5, %c7_i32 : i32
      %161 = arith.fptosi %155 : f32 to i32
      %162 = arith.fptosi %153 : f32 to i32
      %163 = arith.index_cast %161 : i32 to index
      %164 = arith.index_cast %162 : i32 to index
      %165 = memref.load %arg0[%163, %164] : memref<64x128xf32, #tpu.memory_space<smem>>
      %166 = arith.index_cast %161 : i32 to index
      %167 = arith.index_cast %162 : i32 to index
      %168 = memref.load %arg1[%166, %167] : memref<64x128xf32, #tpu.memory_space<smem>>
      %169 = arith.index_cast %161 : i32 to index
      %170 = arith.index_cast %162 : i32 to index
      %171 = memref.load %arg2[%169, %170] : memref<64x128xf32, #tpu.memory_space<smem>>
      %172 = arith.addf %153, %165 : f32
      %173 = arith.addf %155, %168 : f32
      %cst_38 = arith.constant 0.000000e+00 : f32
      %174 = arith.maximumf %172, %cst_38 : f32
      %cst_39 = arith.constant 1.270000e+02 : f32
      %175 = arith.minimumf %174, %cst_39 : f32
      %cst_40 = arith.constant 0.000000e+00 : f32
      %176 = arith.maximumf %173, %cst_40 : f32
      %cst_41 = arith.constant 6.300000e+01 : f32
      %177 = arith.minimumf %176, %cst_41 : f32
      %178 = arith.index_cast %160 : i32 to index
      %179 = memref.load %arg6[%178] : memref<1000xf32, #tpu.memory_space<smem>>
      memref.store %175, %arg6[%178] : memref<1000xf32, #tpu.memory_space<smem>>
      %180 = arith.index_cast %160 : i32 to index
      %181 = memref.load %arg7[%180] : memref<1000xf32, #tpu.memory_space<smem>>
      memref.store %171, %arg7[%180] : memref<1000xf32, #tpu.memory_space<smem>>
      scf.yield %175, %177, %171 : f32, f32, f32
    }
    %c125_i32_2 = arith.constant 125 : i32
    %c0 = arith.constant 0 : index
    %c0_3 = arith.constant 0 : index
    %2 = memref.load %arg3[%c0, %c0_3] : memref<1x1xf32, #tpu.memory_space<smem>>
    memref.store %1#2, %arg3[%c0, %c0_3] : memref<1x1xf32, #tpu.memory_space<smem>>
    %c0_4 = arith.constant 0 : index
    %c0_5 = arith.constant 0 : index
    %3 = memref.load %arg4[%c0_4, %c0_5] : memref<1x1xf32, #tpu.memory_space<smem>>
    memref.store %1#0, %arg4[%c0_4, %c0_5] : memref<1x1xf32, #tpu.memory_space<smem>>
    %c0_6 = arith.constant 0 : index
    %c0_7 = arith.constant 0 : index
    %4 = memref.load %arg5[%c0_6, %c0_7] : memref<1x1xf32, #tpu.memory_space<smem>>
    memref.store %1#1, %arg5[%c0_6, %c0_7] : memref<1x1xf32, #tpu.memory_space<smem>>
    return
  }
}

</mosaic_0001>

<bundles_post_ra>
// kernel: sim.1
= control target key start
LH: loop header
LB: loop body
LE: loop exit
PB: predicated region body
PF: predicated region fallthrough
CT: control target
= control target key end

     0   :  { %s835_s0 = inlined_call_operand.vmem [shape: f32[64,128], index: 0, kind: input, shape index: {}]   ;;  %s836_s1 = inlined_call_operand.vmem [shape: f32[64,128], index: 1, kind: input, shape index: {}]   ;;  %s837_s2 = inlined_call_operand.vmem [shape: f32[64,128], index: 2, kind: input, shape index: {}]   ;;  %s838_s3 = inlined_call_operand.hbm [shape: f32[1,1], index: 3, kind: output, shape index: {0}]   ;;  %s839_s4 = inlined_call_operand.hbm [shape: f32[1,1], index: 4, kind: output, shape index: {1}]   ;;  %s840_s5 = inlined_call_operand.hbm [shape: f32[1,1], index: 5, kind: output, shape index: {2}]   ;;  %s841_s6 = inlined_call_operand.vmem [shape: f32[1000], index: 6, kind: output, shape index: {3}]   ;;  %s842_s7 = inlined_call_operand.hbm [shape: f32[1000], index: 7, kind: output, shape index: {4}]  }
   0x1   :  { %845 = sst [smem:[#allocation22_spill]] %s842_s7 }
   0x2   :  { %13 = vsyncpa [#allocation4], 0 }
   0x3   :  { %14 = vsyncpa [#allocation7], 0 }
   0x4   :  { %15 = vsyncpa [#allocation3], 0 }
   0x5   :  { %16 = vsyncpa [#allocation11], 0 }
   0x6   :  { %17 = vsyncpa [#allocation5], 0 }
   0x7   :  { %18 = vsyncpa [#allocation15], 0  ;;  %s34_s26 = sshll.u32 %s836_s1, 4  ;;  %s23_s29 = sshll.u32 %s835_s0, 4  ;;  %s35_s26 = int_to_ptr.vmem [resolvable:$true] %s34_s26  ;;  %s24_s29 = int_to_ptr.vmem [resolvable:$true] %s23_s29 }
   0x8   :  { %s668_s30 = smov [#allocation6]   ;;  %s669_s8 = smov 128  }
   0x9   :  { %s670_s9 = smov 8   ;;  %s671_s10 = smov [#allocation2]  }
   0xa   :  { %40 = dma.vmem_to_smem %s35_s26, 1024, %s668_s30, [#allocation7], %s669_s8, %s669_s8, %s670_s9  }
   0xb   :  { %29 = dma.vmem_to_smem %s24_s29, 1024, %s671_s10, [#allocation4], %s669_s8, %s669_s8, %s670_s9  }
   0xc   :  { %s45_s13 = sshll.u32 %s837_s2, 4  ;;  %s672_s14 = smov [#allocation8]   ;;  %s46_s13 = int_to_ptr.vmem [resolvable:$true] %s45_s13 }
   0xd   :  { %51 = dma.vmem_to_smem %s46_s13, 1024, %s672_s14, [#allocation7], %s669_s8, %s669_s8, %s670_s9  }
   0xe   :  { %644 = dma.done.wait [#allocation4], 1024  }
   0xf   :  { %645 = vsyncadd [#allocation4], 4294966272 }
  0x10   :  { %646 = dma.done.wait [#allocation7], 2048  }
  0x11   :  { %647 = vsyncadd [#allocation7], 4294965248 }
  0x12   :  { %64 = sfence }
  0x13   :  { %s730_s0 = smov 0.0   ;;  %s732_s1 = smov 0.0  }
  0x14   :  { %s734_s15 = smov 0  }
  0x15 LB: > { %p419_p0 = scmp.lt.s32.totalorder %s658_s0, 0  ;;  %s420_s2 = sceil.f32 %s658_s0  ;;  %s666_s15 = sphi %s734_s15, %s70_s15   ;;  %s662_s1 = sphi %s732_s1, %s848_s1   ;;  %s658_s0 = sphi %s730_s0, %s847_s0  }
  0x16   : > { %s421_s16 = sfloor.f32 %s658_s0  ;;  %p424_p1 = scmp.lt.s32.totalorder %s662_s1, 0 }
  0x17   : > { %s851_s2 = smov (!%p419_p0, %s420_s2), %s421_s16  ;;  %s425_s17 = sceil.f32 %s662_s1 }
  0x18   : > { %s426_s18 = sfloor.f32 %s662_s1  ;;  %s423_s19 = scvt.f32.s32 %s851_s2 }
  0x19   : > { %s853_s17 = smov (!%p424_p1, %s425_s17), %s426_s18  ;;  %s396_s28 = sshll.u32 %s666_s15, 3 }
  0x1a   : > { %s428_s20 = scvt.f32.s32 %s853_s17  ;;  %s673_s9 = smov 0.0  }
  0x1b   : > { %s749_s11 = scalar_lea.smem [#allocation14], %s396_s28  ;;  %s674_s12 = smov 127.0  }
  0x1c   : > { %s77_s21 = sshra.s32 %s428_s20, 7  ;;  %s82_s22 = sand.u32 127, %s428_s20 }
  0x1d   : > { %s79_s23 = sadd.s32 %s423_s19, %s77_s21  ;;  %s843_s2 = smov 63.0  }
  0x1e   : > { %s397_s24 = sshll.u32 %s79_s23, 7  ;;  %s70_s15 = sadd.s32 1, %s666_s15  }
  0x1f   : > { %s83_s25 = sadd.s32 %s397_s24, %s82_s22 }
  0x20   : > { %s84_s26 = sld [smem:[#allocation2 + %s83_s25]] }
  0x21   : > { %s85_s27 = sld [smem:[#allocation6 + %s83_s25]] }
  0x22   : > { %s86_s29 = sld [smem:[#allocation8 + %s83_s25]] }
  0x26   : > { %s87_s30 = sadd.f32 %s662_s1, %s84_s26  ;;  %s759_s1 = scalar_lea.smem [#allocation13], %s396_s28 }
  0x27   : > { %s88_s8 = sadd.f32 %s658_s0, %s85_s27 }
  0x28   : > { %s89_s10 = smax.f32 %s673_s9, %s87_s30  ;;  %96 = sst [smem:[%s749_s11]] %s86_s29 }
  0x29   : > { %s753_s13 = smin.f32 %s674_s12, %s89_s10  ;;  %s91_s14 = smax.f32 %s673_s9, %s88_s8 }
  0x2a   : > { %s757_s0 = smin.f32 %s843_s2, %s91_s14  ;;  %94 = sst [smem:[%s759_s1]] %s753_s13 }
  0x2b   : > { %p429_p2 = scmp.lt.s32.totalorder %s757_s0, 0  ;;  %s430_s16 = sceil.f32 %s757_s0 }
  0x2c   : > { %s431_s17 = sfloor.f32 %s757_s0  ;;  %p434_p3 = scmp.lt.s32.totalorder %s753_s13, 0 }
  0x2d   : > { %s855_s16 = smov (!%p429_p2, %s430_s16), %s431_s17  ;;  %s435_s18 = sceil.f32 %s753_s13 }
  0x2e   : > { %s436_s19 = sfloor.f32 %s753_s13  ;;  %s433_s20 = scvt.f32.s32 %s855_s16 }
  0x2f   : > { %s857_s18 = smov (!%p434_p3, %s435_s18), %s436_s19  ;;  %s345_s30 = scalar_lea.smem %s749_s11, 1 [#allocation14] }
  0x30   : > { %s438_s21 = scvt.f32.s32 %s857_s18  ;;  %s342_s14 = scalar_lea.smem %s759_s1, 1 [#allocation13] }
  0x31   : > { %s846_s18 = smov 63.0   ;;  %p67_p2 = scmp.ge.s32.totalorder %s70_s15, 125  }
  0x32   : > { %s100_s22 = sshra.s32 %s438_s21, 7  ;;  %s105_s23 = sand.u32 127, %s438_s21 }
  0x33   : > { %s102_s24 = sadd.s32 %s433_s20, %s100_s22 }
  0x34   : > { %s398_s25 = sshll.u32 %s102_s24, 7 }
  0x35   : > { %s106_s26 = sadd.s32 %s398_s25, %s105_s23 }
  0x36   : > { %s107_s27 = sld [smem:[#allocation2 + %s106_s26]] }
  0x37   : > { %s108_s28 = sld [smem:[#allocation6 + %s106_s26]] }
  0x38   : > { %s109_s29 = sld [smem:[#allocation8 + %s106_s26]] }
  0x3c   : > { %s110_s8 = sadd.f32 %s107_s27, %s753_s13 }
  0x3d   : > { %s111_s10 = sadd.f32 %s108_s28, %s757_s0 }
  0x3e   : > { %s112_s17 = smax.f32 %s673_s9, %s110_s8  ;;  %119 = sst [smem:[%s345_s30]] %s109_s29 }
  0x3f   : > { %s113_s2 = smin.f32 %s674_s12, %s112_s17  ;;  %s114_s16 = smax.f32 %s673_s9, %s111_s10 }
  0x40   : > { %s115_s19 = smin.f32 %s846_s18, %s114_s16  ;;  %117 = sst [smem:[%s342_s14]] %s113_s2 }
  0x41   : > { %p439_p4 = scmp.lt.s32.totalorder %s115_s19, 0  ;;  %s440_s20 = sceil.f32 %s115_s19 }
  0x42   : > { %s441_s21 = sfloor.f32 %s115_s19  ;;  %p444_p5 = scmp.lt.s32.totalorder %s113_s2, 0 }
  0x43   : > { %s859_s20 = smov (!%p439_p4, %s440_s20), %s441_s21  ;;  %s445_s22 = sceil.f32 %s113_s2 }
  0x44   : > { %s446_s13 = sfloor.f32 %s113_s2  ;;  %s443_s0 = scvt.f32.s32 %s859_s20 }
  0x45   : > { %s861_s22 = smov (!%p444_p5, %s445_s22), %s446_s13  ;;  %s351_s10 = scalar_lea.smem %s749_s11, 2 [#allocation14] }
  0x46   : > { %s448_s23 = scvt.f32.s32 %s861_s22  ;;  %s348_s16 = scalar_lea.smem %s759_s1, 2 [#allocation13] }
  0x48   : > { %s123_s24 = sshra.s32 %s448_s23, 7  ;;  %s128_s25 = sand.u32 127, %s448_s23 }
  0x49   : > { %s125_s26 = sadd.s32 %s443_s0, %s123_s24 }
  0x4a   : > { %s401_s27 = sshll.u32 %s125_s26, 7 }
  0x4b   : > { %s129_s28 = sadd.s32 %s401_s27, %s128_s25 }
  0x4c   : > { %s130_s29 = sld [smem:[#allocation2 + %s129_s28]] }
  0x4d   : > { %s131_s30 = sld [smem:[#allocation6 + %s129_s28]] }
  0x4e   : > { %s132_s8 = sld [smem:[#allocation8 + %s129_s28]] }
  0x52   : > { %s133_s14 = sadd.f32 %s130_s29, %s113_s2 }
  0x53   : > { %s134_s17 = sadd.f32 %s131_s30, %s115_s19 }
  0x54   : > { %s135_s21 = smax.f32 %s673_s9, %s133_s14  ;;  %142 = sst [smem:[%s351_s10]] %s132_s8 }
  0x55   : > { %s136_s7 = smin.f32 %s674_s12, %s135_s21  ;;  %s137_s20 = smax.f32 %s673_s9, %s134_s17 }
  0x56   : > { %s138_s22 = smin.f32 %s846_s18, %s137_s20  ;;  %140 = sst [smem:[%s348_s16]] %s136_s7 }
  0x57   : > { %p449_p6 = scmp.lt.s32.totalorder %s138_s22, 0  ;;  %s450_s13 = sceil.f32 %s138_s22 }
  0x58   : > { %s451_s0 = sfloor.f32 %s138_s22  ;;  %p454_p7 = scmp.lt.s32.totalorder %s136_s7, 0 }
  0x59   : > { %s863_s13 = smov (!%p449_p6, %s450_s13), %s451_s0  ;;  %s455_s23 = sceil.f32 %s136_s7 }
  0x5a   : > { %s456_s2 = sfloor.f32 %s136_s7  ;;  %s453_s19 = scvt.f32.s32 %s863_s13 }
  0x5b   : > { %s865_s23 = smov (!%p454_p7, %s455_s23), %s456_s2  ;;  %s357_s14 = scalar_lea.smem %s749_s11, 3 [#allocation14] }
  0x5c   : > { %s458_s24 = scvt.f32.s32 %s865_s23  ;;  %s354_s21 = scalar_lea.smem %s759_s1, 3 [#allocation13] }
  0x5e   : > { %s146_s25 = sshra.s32 %s458_s24, 7  ;;  %s151_s26 = sand.u32 127, %s458_s24 }
  0x5f   : > { %s148_s27 = sadd.s32 %s453_s19, %s146_s25 }
  0x60   : > { %s404_s28 = sshll.u32 %s148_s27, 7 }
  0x61   : > { %s152_s29 = sadd.s32 %s404_s28, %s151_s26 }
  0x62   : > { %s153_s30 = sld [smem:[#allocation2 + %s152_s29]] }
  0x63   : > { %s154_s8 = sld [smem:[#allocation6 + %s152_s29]] }
  0x64   : > { %s155_s10 = sld [smem:[#allocation8 + %s152_s29]] }
  0x68   : > { %s156_s17 = sadd.f32 %s153_s30, %s136_s7 }
  0x69   : > { %s157_s16 = sadd.f32 %s154_s8, %s138_s22 }
  0x6a   : > { %s158_s20 = smax.f32 %s673_s9, %s156_s17  ;;  %165 = sst [smem:[%s357_s14]] %s155_s10 }
  0x6b   : > { %s159_s0 = smin.f32 %s674_s12, %s158_s20  ;;  %s160_s13 = smax.f32 %s673_s9, %s157_s16 }
  0x6c   : > { %s161_s23 = smin.f32 %s846_s18, %s160_s13  ;;  %163 = sst [smem:[%s354_s21]] %s159_s0 }
  0x6d   : > { %p459_p8 = scmp.lt.s32.totalorder %s161_s23, 0  ;;  %s460_s2 = sceil.f32 %s161_s23 }
  0x6e   : > { %s461_s19 = sfloor.f32 %s161_s23  ;;  %p464_p9 = scmp.lt.s32.totalorder %s159_s0, 0 }
  0x6f   : > { %s867_s2 = smov (!%p459_p8, %s460_s2), %s461_s19  ;;  %s465_s24 = sceil.f32 %s159_s0 }
  0x70   : > { %s466_s7 = sfloor.f32 %s159_s0  ;;  %s463_s22 = scvt.f32.s32 %s867_s2 }
  0x71   : > { %s869_s24 = smov (!%p464_p9, %s465_s24), %s466_s7  ;;  %s363_s17 = scalar_lea.smem %s749_s11, 4 [#allocation14] }
  0x72   : > { %s468_s25 = scvt.f32.s32 %s869_s24  ;;  %s360_s20 = scalar_lea.smem %s759_s1, 4 [#allocation13] }
  0x74   : > { %s169_s26 = sshra.s32 %s468_s25, 7  ;;  %s174_s27 = sand.u32 127, %s468_s25 }
  0x75   : > { %s171_s28 = sadd.s32 %s463_s22, %s169_s26 }
  0x76   : > { %s407_s29 = sshll.u32 %s171_s28, 7 }
  0x77   : > { %s175_s30 = sadd.s32 %s407_s29, %s174_s27 }
  0x78   : > { %s176_s8 = sld [smem:[#allocation2 + %s175_s30]] }
  0x79   : > { %s177_s10 = sld [smem:[#allocation6 + %s175_s30]] }
  0x7a   : > { %s178_s14 = sld [smem:[#allocation8 + %s175_s30]] }
  0x7e   : > { %s179_s16 = sadd.f32 %s176_s8, %s159_s0 }
  0x7f   : > { %s180_s21 = sadd.f32 %s177_s10, %s161_s23 }
  0x80   : > { %s181_s13 = smax.f32 %s673_s9, %s179_s16  ;;  %188 = sst [smem:[%s363_s17]] %s178_s14 }
  0x81   : > { %s182_s19 = smin.f32 %s674_s12, %s181_s13  ;;  %s183_s2 = smax.f32 %s673_s9, %s180_s21 }
  0x82   : > { %s184_s24 = smin.f32 %s846_s18, %s183_s2  ;;  %186 = sst [smem:[%s360_s20]] %s182_s19 }
  0x83   : > { %p469_p10 = scmp.lt.s32.totalorder %s184_s24, 0  ;;  %s470_s7 = sceil.f32 %s184_s24 }
  0x84   : > { %s471_s22 = sfloor.f32 %s184_s24  ;;  %p474_p11 = scmp.lt.s32.totalorder %s182_s19, 0 }
  0x85   : > { %s871_s7 = smov (!%p469_p10, %s470_s7), %s471_s22  ;;  %s475_s25 = sceil.f32 %s182_s19 }
  0x86   : > { %s476_s0 = sfloor.f32 %s182_s19  ;;  %s473_s23 = scvt.f32.s32 %s871_s7 }
  0x87   : > { %s873_s25 = smov (!%p474_p11, %s475_s25), %s476_s0  ;;  %s369_s16 = scalar_lea.smem %s749_s11, 5 [#allocation14] }
  0x88   : > { %s478_s26 = scvt.f32.s32 %s873_s25  ;;  %s366_s13 = scalar_lea.smem %s759_s1, 5 [#allocation13] }
  0x8a   : > { %s192_s27 = sshra.s32 %s478_s26, 7  ;;  %s197_s28 = sand.u32 127, %s478_s26 }
  0x8b   : > { %s194_s29 = sadd.s32 %s473_s23, %s192_s27 }
  0x8c   : > { %s410_s30 = sshll.u32 %s194_s29, 7 }
  0x8d   : > { %s198_s8 = sadd.s32 %s410_s30, %s197_s28 }
  0x8e   : > { %s199_s10 = sld [smem:[#allocation2 + %s198_s8]] }
  0x8f   : > { %s200_s14 = sld [smem:[#allocation6 + %s198_s8]] }
  0x90   : > { %s201_s17 = sld [smem:[#allocation8 + %s198_s8]] }
  0x94   : > { %s202_s21 = sadd.f32 %s199_s10, %s182_s19 }
  0x95   : > { %s203_s20 = sadd.f32 %s200_s14, %s184_s24 }
  0x96   : > { %s204_s2 = smax.f32 %s673_s9, %s202_s21  ;;  %211 = sst [smem:[%s369_s16]] %s201_s17 }
  0x97   : > { %s205_s22 = smin.f32 %s674_s12, %s204_s2  ;;  %s206_s7 = smax.f32 %s673_s9, %s203_s20 }
  0x98   : > { %s207_s25 = smin.f32 %s846_s18, %s206_s7  ;;  %209 = sst [smem:[%s366_s13]] %s205_s22 }
  0x99   : > { %p479_p12 = scmp.lt.s32.totalorder %s207_s25, 0  ;;  %s480_s0 = sceil.f32 %s207_s25 }
  0x9a   : > { %s481_s23 = sfloor.f32 %s207_s25  ;;  %p484_p13 = scmp.lt.s32.totalorder %s205_s22, 0 }
  0x9b   : > { %s875_s0 = smov (!%p479_p12, %s480_s0), %s481_s23  ;;  %s485_s26 = sceil.f32 %s205_s22 }
  0x9c   : > { %s486_s19 = sfloor.f32 %s205_s22  ;;  %s483_s24 = scvt.f32.s32 %s875_s0 }
  0x9d   : > { %s877_s26 = smov (!%p484_p13, %s485_s26), %s486_s19  ;;  %s375_s21 = scalar_lea.smem %s749_s11, 6 [#allocation14] }
  0x9e   : > { %s488_s27 = scvt.f32.s32 %s877_s26  ;;  %s372_s2 = scalar_lea.smem %s759_s1, 6 [#allocation13] }
  0xa0   : > { %s215_s28 = sshra.s32 %s488_s27, 7  ;;  %s220_s29 = sand.u32 127, %s488_s27 }
  0xa1   : > { %s217_s30 = sadd.s32 %s483_s24, %s215_s28 }
  0xa2   : > { %s413_s8 = sshll.u32 %s217_s30, 7 }
  0xa3   : > { %s221_s10 = sadd.s32 %s413_s8, %s220_s29 }
  0xa4   : > { %s222_s14 = sld [smem:[#allocation2 + %s221_s10]] }
  0xa5   : > { %s223_s17 = sld [smem:[#allocation6 + %s221_s10]] }
  0xa6   : > { %s224_s16 = sld [smem:[#allocation8 + %s221_s10]] }
  0xaa   : > { %s225_s20 = sadd.f32 %s222_s14, %s205_s22 }
  0xab   : > { %s226_s13 = sadd.f32 %s223_s17, %s207_s25 }
  0xac   : > { %s227_s7 = smax.f32 %s673_s9, %s225_s20  ;;  %234 = sst [smem:[%s375_s21]] %s224_s16 }
  0xad   : > { %s228_s23 = smin.f32 %s674_s12, %s227_s7  ;;  %s229_s0 = smax.f32 %s673_s9, %s226_s13 }
  0xae   : > { %s230_s26 = smin.f32 %s846_s18, %s229_s0  ;;  %232 = sst [smem:[%s372_s2]] %s228_s23 }
  0xaf   : > { %p489_p0 = scmp.lt.s32.totalorder %s230_s26, 0  ;;  %s490_s19 = sceil.f32 %s230_s26 }
  0xb0   : > { %s491_s24 = sfloor.f32 %s230_s26  ;;  %p494_p1 = scmp.lt.s32.totalorder %s228_s23, 0 }
  0xb1   : > { %s879_s19 = smov (!%p489_p0, %s490_s19), %s491_s24  ;;  %s495_s27 = sceil.f32 %s228_s23 }
  0xb2   : > { %s496_s22 = sfloor.f32 %s228_s23  ;;  %s493_s25 = scvt.f32.s32 %s879_s19 }
  0xb3   : > { %s881_s27 = smov (!%p494_p1, %s495_s27), %s496_s22  ;;  %s381_s20 = scalar_lea.smem %s749_s11, 7 [#allocation14] }
  0xb4   : > { %s498_s28 = scvt.f32.s32 %s881_s27  ;;  %s378_s7 = scalar_lea.smem %s759_s1, 7 [#allocation13] }
  0xb5   :  { %s269_s22 = sshll.u32 (%p67_p2), %s838_s3, 4  ;;  %s270_s22 = int_to_ptr.hbm [resolvable:$true] %s269_s22 }
  0xb6   : > { %s238_s29 = sshra.s32 %s498_s28, 7  ;;  %s243_s30 = sand.u32 127, %s498_s28 }
  0xb7   : > { %s240_s8 = sadd.s32 %s493_s25, %s238_s29  ;;  %s677_s25 = smov (%p67_p2), [#allocation9]  }
  0xb8   : > { %s416_s10 = sshll.u32 %s240_s8, 7  ;;  %s678_s29 = smov (%p67_p2), [#allocation12]  }
  0xb9   : > { %s244_s14 = sadd.s32 %s416_s10, %s243_s30  ;;  %s296_s8 = sshll.u32 (%p67_p2), %s841_s6, 4  ;;  %s297_s8 = int_to_ptr.vmem [resolvable:$true] %s296_s8 }
  0xba   : > { %s245_s17 = sld [smem:[#allocation2 + %s244_s14]] }
  0xbb   : > { %s246_s16 = sld [smem:[#allocation6 + %s244_s14]] }
  0xbc   : > { %s247_s21 = sld [smem:[#allocation8 + %s244_s14]] }
  0xc0   : > { %s248_s13 = sadd.f32 %s245_s17, %s228_s23 }
  0xc1   : > { %s249_s2 = sadd.f32 %s246_s16, %s230_s26  ;;  %69 = sbr.rel (!%p67_p2) target bundleno = 21 (0x15), region = 102 }
  0xc2   : > { %s250_s0 = smax.f32 %s673_s9, %s248_s13  ;;  %257 = sst [smem:[%s381_s20]] %s247_s21 }
  0xc3   : > { %s251_s24 = smin.f32 %s674_s12, %s250_s0   ;;  %s252_s19 = smax.f32 %s673_s9, %s249_s2 }
  0xc4   : > { %s253_s27 = smin.f32 %s846_s18, %s252_s19   ;;  %255 = sst [smem:[%s378_s7]] %s251_s24 }
  0xc5   : > { %s847_s0 = smov %s253_s27  ;;  %s848_s1 = smov %s251_s24 }
  0xc6   :  { %261 = sst [smem:[#allocation10]] %s251_s24  ;;  %s278_s12 = sshll.u32 %s839_s4, 4  ;;  %s279_s12 = int_to_ptr.hbm [resolvable:$true] %s278_s12 }
  0xc7   :  { %s676_s9 = smov [#allocation10]   ;;  %259 = sst [smem:[#allocation9]] %s247_s21 }
  0xc8   :  { %281 = dma.smem_to_hbm %s676_s9, 16, %s279_s12, [#allocation11]  }
  0xc9   :  { %272 = dma.smem_to_hbm %s677_s25, 16, %s270_s22, [#allocation3]  }
  0xca   :  { %263 = sst [smem:[#allocation12]] %s253_s27  ;;  %s287_s1 = sshll.u32 %s840_s5, 4  ;;  %s288_s1 = int_to_ptr.hbm [resolvable:$true] %s287_s1 }
  0xcb   :  { %290 = dma.smem_to_hbm %s678_s29, 16, %s288_s1, [#allocation11]  }
  0xcc   :  { %s849_s17 = sld [smem:[#allocation22_spill]]  ;;  %s679_s16 = smov [#allocation13]  }
  0xcd   :  { %299 = dma.smem_to_vmem %s679_s16, 128, %s297_s8, [#allocation5]  }
  0xce   :  { %s680_s21 = smov [#allocation14]  }
  0xd2   :  { %s305_s3 = sshll.u32 %s849_s17, 4  ;;  %s306_s3 = int_to_ptr.hbm [resolvable:$true] %s305_s3 }
  0xd3   :  { %308 = dma.smem_to_hbm %s680_s21, 128, %s306_s3, [#allocation15]  }
  0xd4   :  { %648 = dma.done.wait [#allocation3], 16  }
  0xd5   :  { %649 = vsyncadd [#allocation3], 4294967280 }
  0xd6   :  { %650 = dma.done.wait [#allocation11], 32  }
  0xd7   :  { %651 = vsyncadd [#allocation11], 4294967264 }
  0xd8   :  { %652 = dma.done.wait [#allocation5], 128  }
  0xd9   :  { %653 = vsyncadd [#allocation5], 4294967168 }
  0xda   :  { %654 = dma.done.wait [#allocation15], 128  }
  0xdb   :  { %655 = vsyncadd [#allocation15], 4294967168 }
  0xdc   :  { %329 = sfence }
  0xdd   :  { %330 = vsyncpa [#allocation3], 1 }
  0xde   :  { %331 = vsyncpa [#allocation11], 1 }
  0xdf   :  { %332 = vsyncpa [#allocation15], 1 }
  0xe0   :  { %333 = vsyncpa [#allocation4], 1 }
  0xe1   :  { %334 = vsyncpa [#allocation7], 1 }
  0xe2   :  { %335 = vsyncpa [#allocation5], 1 }

</bundles_post_ra>
